<compile_context>
chip_gen: v5e
topology: v5e:2x2
jax: 0.10.0
libtpu: 0.0.40
codegen_flags: <defaults>
</compile_context>

<pallas_src>
import jax
import jax.numpy as jnp
from jax.experimental import pallas as pl
from jax.experimental.pallas import tpu as pltpu


def _upsample_conv_kernel(x_ref, w_ref, b_ref, o_ref):
    # x_ref: (nb, H, 3*W*Cin)    row-tap-folded input block (compute_dtype)
    # w_ref: (3*W*Cin, 4*W*Cout) banded weight (compute_dtype), VMEM-resident
    # b_ref: (1, 4*W*Cout)       bias tiled as (p, b, q, co), f32
    # o_ref: (nb, H, 4*W*Cout)   output block, columns ordered (p, b, q, co)
    nb, h, k = x_ref.shape
    a = x_ref[...].reshape(nb * h, k)
    acc = jnp.dot(a, w_ref[...], preferred_element_type=jnp.float32)
    acc = acc + b_ref[...]                       # (1, 4*W*Cout) broadcasts over rows
    o_ref[...] = acc.reshape(o_ref.shape).astype(o_ref.dtype)


def prepare_upsample_conv_weights(w_oihw, bias, W, compute_dtype=jnp.bfloat16):
    """Fold the 3x3 taps, the x2-nearest subpixel phases and the zero column padding into
    one banded (3*W*Cin, 4*W*Cout) matrix.  Cache/jit this when conv weights are static."""
    Cout, Cin, KH, KW = w_oihw.shape
    assert KH == 3 and KW == 3
    # Row selector: R[p, r, ky] = 1 iff upsampled row 2a+p+ky-1 reads original row a+r-1
    # (r indexes the 3 lane-folded row taps {a-1, a, a+1}).
    R = jnp.array([[[1., 0., 0.],
                    [0., 1., 1.],
                    [0., 0., 0.]],
                   [[0., 0., 0.],
                    [1., 1., 0.],
                    [0., 0., 1.]]], jnp.float32)                        # (p, r, ky)
    # Column selector (also encodes the zero column padding):
    # C[j, b, q, kx] = 1 iff upsampled column 2b+q+kx-1 reads original column j.
    dc = jnp.array([[-1, 0, 0], [0, 0, 1]], jnp.int32)                   # (q, kx)
    jj = jnp.arange(W)[:, None, None, None]
    bb = jnp.arange(W)[None, :, None, None]
    Ccol = (jj == bb + dc[None, None]).astype(jnp.float32)               # (j, b, q, kx)
    w_t = jnp.transpose(w_oihw, (2, 3, 1, 0)).astype(jnp.float32)        # (ky, kx, ci, co)
    w_full = jnp.einsum('prk,jbql,klco->rjcpbqo', R, Ccol, w_t)          # (r,j,ci,p,b,q,co)
    w_full = w_full.reshape(3 * W * Cin, 4 * W * Cout).astype(compute_dtype)
    bias_tile = jnp.tile(bias.astype(jnp.float32), 4 * W).reshape(1, 4 * W * Cout)
    return w_full, bias_tile


def upsample_conv(x_nchw, w_oihw, bias, *, scale_factor=2,
                  compute_dtype=jnp.bfloat16, batch_block=1):
    """UpsampleConv.forward: nearest x2 upsample then Conv2d(k=3, padding=1)."""
    N, Cin, H, W = x_nchw.shape
    Cout, Cin_w, KH, KW = w_oihw.shape
    assert Cin == Cin_w and KH == 3 and KW == 3 and scale_factor == 2
    assert N % batch_block == 0
    nb = batch_block

    WCin3, WCout4 = 3 * W * Cin, 4 * W * Cout

    # NCHW -> NHWC on the ORIGINAL (un-upsampled) tensor, zero-pad rows, fold the three
    # row taps {a-1, a, a+1} onto lanes.  Tiny; all static slices; already compute_dtype.
    x_nhwc = jnp.transpose(x_nchw, (0, 2, 3, 1)).reshape(N, H, W * Cin).astype(compute_dtype)
    x_pad = jnp.pad(x_nhwc, ((0, 0), (1, 1), (0, 0)))
    x_taps = jnp.concatenate(
        [x_pad[:, 0:H], x_pad[:, 1:H + 1], x_pad[:, 2:H + 2]], axis=-1)  # (N, H, 3*W*Cin)

    w_full, bias_tile = prepare_upsample_conv_weights(w_oihw, bias, W, compute_dtype)

    out_ph = pl.pallas_call(
        _upsample_conv_kernel,
        out_shape=jax.ShapeDtypeStruct((N, H, WCout4), x_nchw.dtype),
        grid=(N // nb,),
        in_specs=[
            pl.BlockSpec((nb, H, WCin3), lambda n: (n, 0, 0)),
            pl.BlockSpec((WCin3, WCout4), lambda n: (0, 0)),   # constant index -> resident
            pl.BlockSpec((1, WCout4), lambda n: (0, 0)),
        ],
        out_specs=pl.BlockSpec((nb, H, WCout4), lambda n: (n, 0, 0)),
        compiler_params=pltpu.CompilerParams(dimension_semantics=("parallel",)),
    )(x_taps, w_full, bias_tile)

    # Single NHWC->NCHW pass; columns are already q-interleaved, only rows (p) interleave.
    out = out_ph.reshape(N, H, 2, 2 * W, Cout)     # (n, a, p, j, co)
    out = jnp.transpose(out, (0, 4, 1, 2, 3))      # (n, co, a, p, j)
    return out.reshape(N, Cout, 2 * H, 2 * W)


if __name__ == "__main__":
    # UpsampleConv(dim_in=4, dim_out=8, conv_ctor=nn.Conv2d, kernel_size=3, scale_factor=2)
    N, Cin, Cout, H, W, K = 2, 4, 8, 16, 16, 3

    key = jax.random.PRNGKey(0)
    kx, kw, kb = jax.random.split(key, 3)
    x = jax.random.normal(kx, (N, Cin, H, W), dtype=jnp.float32)

    # Conv2d-style deterministic init: U(-k, k), k = 1/sqrt(fan_in)
    fan_in = Cin * K * K
    bound = 1.0 / jnp.sqrt(float(fan_in))
    weight = jax.random.uniform(kw, (Cout, Cin, K, K), jnp.float32, -bound, bound)
    bias = jax.random.uniform(kb, (Cout,), jnp.float32, -bound, bound)

    # Reference: nearest x2 upsample + SAME 3x3 conv (same semantics as the PyTorch module).
    x_up = jnp.repeat(jnp.repeat(x, 2, axis=2), 2, axis=3)
    ref = jax.lax.conv_general_dilated(
        x_up, weight, window_strides=(1, 1), padding="SAME",
        dimension_numbers=("NCHW", "OIHW", "NCHW"),
    ) + bias[None, :, None, None]

    # f32 MXU operands: tight check.
    out_f32 = jax.block_until_ready(
        upsample_conv(x, weight, bias, compute_dtype=jnp.float32))
    assert out_f32.shape == (N, Cout, 2 * H, 2 * W)
    assert jnp.allclose(out_f32, ref, atol=1e-4, rtol=1e-4)

    # bf16 MXU operands (recommended on v6e/v7x): loosened tolerance (bf16 mantissa).
    out_bf16 = jax.block_until_ready(
        upsample_conv(x, weight, bias, compute_dtype=jnp.bfloat16))
    assert out_bf16.shape == (N, Cout, 2 * H, 2 * W)
    assert jnp.allclose(out_bf16, ref, atol=5e-2, rtol=5e-2)

    print("KERNEL_OK")
</pallas_src>

<mosaic_0001>
module attributes {stable_mosaic.version = 11 : i64} {
  func.func @_upsample_conv_kernel(%arg0: i32, %arg1: memref<1x16x192xf32, #tpu.memory_space<vmem>>, %arg2: memref<192x512xf32, #tpu.memory_space<vmem>>, %arg3: memref<1x512xf32, #tpu.memory_space<vmem>>, %arg4: memref<1x16x512xf32, #tpu.memory_space<vmem>>) attributes {dimension_semantics = [#tpu.dimension_semantics<parallel>], iteration_bounds = array<i64: 2>, scalar_prefetch = 0 : i64, scratch_operands = 0 : i64, tpu.core_type = #tpu.core_type<tc>, window_params = [{transform_indices = @transform_0, window_bounds = array<i64: 1, 16, 192>}, {pipeline_mode = #tpu.pipeline_mode<synchronous>, transform_indices = @transform_1, window_bounds = array<i64: 192, 512>}, {pipeline_mode = #tpu.pipeline_mode<synchronous>, transform_indices = @transform_2, window_bounds = array<i64: 1, 512>}, {transform_indices = @transform_3, window_bounds = array<i64: 1, 16, 512>}]} {
    %c0 = arith.constant 0 : index
    %c0_0 = arith.constant 0 : index
    %c0_1 = arith.constant 0 : index
    %0 = vector.load %arg1[%c0, %c0_0, %c0_1] : memref<1x16x192xf32, #tpu.memory_space<vmem>>, vector<1x16x192xf32>
    %1 = vector.shape_cast %0 : vector<1x16x192xf32> to vector<16x192xf32>
    %c0_2 = arith.constant 0 : index
    %c0_3 = arith.constant 0 : index
    %2 = vector.load %arg2[%c0_2, %c0_3] : memref<192x512xf32, #tpu.memory_space<vmem>>, vector<192x512xf32>
    %cst = arith.constant dense<0.000000e+00> : vector<16x512xf32>
    %3 = tpu.matmul %1, %2, %cst {dimension_numbers = #tpu.dot_dimension_numbers<[1], [0], [0], [1], [0, 0, 1, 1], [], []>} : vector<16x192xf32>, vector<192x512xf32>, vector<16x512xf32> -> vector<16x512xf32>
    %c0_4 = arith.constant 0 : index
    %c0_5 = arith.constant 0 : index
    %4 = vector.load %arg3[%c0_4, %c0_5] : memref<1x512xf32, #tpu.memory_space<vmem>>, vector<1x512xf32>
    %5 = vector.broadcast %4 : vector<1x512xf32> to vector<16x512xf32>
    %6 = arith.addf %3, %5 : vector<16x512xf32>
    %7 = vector.shape_cast %6 : vector<16x512xf32> to vector<1x16x512xf32>
    %c0_6 = arith.constant 0 : index
    %c0_7 = arith.constant 0 : index
    %c0_8 = arith.constant 0 : index
    %8 = vector.load %arg4[%c0_6, %c0_7, %c0_8] : memref<1x16x512xf32, #tpu.memory_space<vmem>>, vector<1x16x512xf32>
    tpu.vector_store %arg4[%c0_6, %c0_7, %c0_8], %7 {strides = array<i32>} : memref<1x16x512xf32, #tpu.memory_space<vmem>>, vector<1x16x512xf32>,
    return
  }
  func.func @transform_0(%arg0: i32) -> (i32, i32, i32) {
    %c0_i32 = arith.constant 0 : i32
    %c0_i32_0 = arith.constant 0 : i32
    %c0_i32_1 = arith.constant 0 : i32
    return %arg0, %c0_i32, %c0_i32_0 : i32, i32, i32
  }
  func.func @transform_1(%arg0: i32) -> (i32, i32) {
    %c0_i32 = arith.constant 0 : i32
    %c0_i32_0 = arith.constant 0 : i32
    %c0_i32_1 = arith.constant 0 : i32
    return %c0_i32, %c0_i32_0 : i32, i32
  }
  func.func @transform_2(%arg0: i32) -> (i32, i32) {
    %c0_i32 = arith.constant 0 : i32
    %c0_i32_0 = arith.constant 0 : i32
    %c0_i32_1 = arith.constant 0 : i32
    return %c0_i32, %c0_i32_0 : i32, i32
  }
  func.func @transform_3(%arg0: i32) -> (i32, i32, i32) {
    %c0_i32 = arith.constant 0 : i32
    %c0_i32_0 = arith.constant 0 : i32
    %c0_i32_1 = arith.constant 0 : i32
    return %arg0, %c0_i32, %c0_i32_0 : i32, i32, i32
  }
}

</mosaic_0001>

<bundles_post_ra>
// kernel: tpu_custom_call.1
= control target key start
LH: loop header
LB: loop body
LE: loop exit
PB: predicated region body
PF: predicated region fallthrough
CT: control target
= control target key end

     0   :  { %8 = vsyncpa [#allocation3], 0  ;;  %s1137_s0 = inlined_call_operand.hbm [shape: f32[2,16,192], index: 0, kind: input, shape index: {}]   ;;  %s1138_s1 = inlined_call_operand.hbm [shape: f32[192,512], index: 1, kind: input, shape index: {}]   ;;  %s1139_s2 = inlined_call_operand.hbm [shape: f32[1,512], index: 2, kind: input, shape index: {}]   ;;  %s1140_s3 = inlined_call_operand.hbm [shape: f32[2,16,512], index: 3, kind: output, shape index: {}]  }
   0x1   :  { %10 = vsyncpa [#allocation3 + $0x1], 0 }
   0x2   :  { %11 = vsyncpa [#allocation6], 0 }
   0x3   :  { %12 = vsyncpa [#allocation4], 0 }
   0x4   :  { %14 = vsyncpa [#allocation4 + $0x1], 0  ;;  %s946_s12 = smov 0   ;;  %s948_s13 = smov 0  }
   0x5   :  { %s950_s14 = smov 0   ;;  %s952_s15 = smov 0  }
   0x6 LB: > { %s967_s16 = sadd.s32 4294967295, %s916_s15   ;;  %s639_s17 = sadd.s32 4294967294, %s916_s15   ;;  %s916_s15 = sphi %s952_s15, %s1150_s15   ;;  %s912_s14 = sphi %s950_s14, %s1149_s14   ;;  %s908_s13 = sphi %s948_s13, %s1148_s13   ;;  %s904_s12 = sphi %s946_s12, %s1147_s12  }
   0x7   : > { %p40_p0 = scmp.ne.s32.totalorder %s908_s13, %s904_s12  ;;  %p41_p1 = scmp.eq.s32.totalorder %s967_s16, 0 }
   0x8   : > { %p106_p2 = scmp.eq.s32.totalorder %s967_s16, 1  ;;  %p112_p3 = scmp.eq.s32.totalorder %s639_s17, 1 }
   0x9   : > { %p976_p4 = por %p41_p1, %p40_p0  ;;  %p640_p5 = scmp.ge.s32.totalorder %s916_s15, 1 }
   0xa   : > { %p981_p6 = por %p112_p3, %p40_p0  ;;  %p119_p7 = scmp.lt.s32.totalorder %s916_s15, 3 }
   0xb   : > { %s130_s22 = sshll.u32 %s1138_s1, 4  ;;  %s918_s24 = smov [#allocation5]   ;;  %s131_s22 = int_to_ptr.hbm [resolvable:$true] %s130_s22 }
   0xc   : > { %p989_p8 = pnand %p640_p5, %p119_p7  ;;  %s132_s25 = sshll.u32 %s918_s24, 4  ;;  %s133_s25 = int_to_ptr.vmem [resolvable:$true] %s132_s25 }
   0xd   : > { %s145_s28 = sshll.u32 %s1139_s2, 4  ;;  %s919_s29 = smov 512   ;;  %s146_s28 = int_to_ptr.hbm [resolvable:$true] %s145_s28 }
   0xe   : > { %p695_p9 = pneg %p989_p8  ;;  %s920_s30 = smov 32  }
   0xf   : > { %s921_s4 = smov [#allocation7]   ;;  %s1002_s6 = sadd.s32 1, %s916_s15  }
  0x10   : > { %p696_p10 = pnand %p695_p9, %p41_p1  ;;  %s147_s5 = sshll.u32 %s921_s4, 4  ;;  %s148_s5 = int_to_ptr.vmem [resolvable:$true] %s147_s5 }
  0x11   : > { %s27_s7 = sadd.s32 1, %s912_s14  ;;  %s24_s8 = ssub.s32 %s916_s15, %s1002_s6 }
  0x12   : > { %698 = dma.hbm_to_vmem [thread:$0]  (!%p696_p10), %s131_s22, 12288, %s133_s25, [#allocation6], %s919_s29, %s919_s29, %s920_s30  }
  0x13   : > { %701 = dma.hbm_to_vmem [thread:$0]  (!%p696_p10), %s146_s28, 64, %s148_s5, [#allocation6]  }
  0x14   : > { %p34_p12 = scmp.ne.s32.totalorder %s912_s14, %s908_s13  ;;  %p25_p13 = scmp.eq.s32.totalorder %s24_s8, 0 }
  0x15   : > { %p35_p0 = scmp.eq.s32.totalorder %s916_s15, 0  ;;  %p712_p5 = scmp.lt.s32.totalorder %s916_s15, 2 }
  0x16   : > { %p1012_p3 = por %p106_p2, %p34_p12  ;;  %s158_s11 = sand.u32 1, %s912_s14  }
  0x17   : > { %s1018_s10 = scalar_select %p25_p13, %s912_s14, %s27_s7  }
  0x18   : > { %p36_p7 = por %p35_p0, %p34_p12  ;;  %s644_s17 = sshll.u32 %s158_s11, 5 }
  0x19   : > { %s665_s20 = sshll.u32 %s916_s15, 5  ;;  %s162_s25 = scalar_lea.vmem [#allocation2], %s644_s17 }
  0x1a   : > { %s167_s24 = scalar_lea.hbm %s1137_s0, %s665_s20  ;;  %s170_s26 = sshll.u32 %s162_s25, 4  ;;  %s171_s26 = int_to_ptr.vmem [resolvable:$true] %s170_s26 }
  0x1b   : > { %s168_s27 = sshll.u32 %s167_s24, 4  ;;  %p1025_p2 = pnand %p712_p5, %p36_p7  ;;  %s169_s27 = int_to_ptr.hbm [resolvable:$true] %s168_s27 }
  0x1c   : > { %s159_s29 = scalar_lea.sflag [#allocation3], %s158_s11  ;;  %s816_s30 = sshra.s32 %s169_s27, 4  ;;  %s817_s30 = int_to_ptr.hbm [resolvable:$true] %s816_s30 }
  0x1d   : > { %s818_s4 = scalar_lea.hbm %s817_s30, 32  ;;  %p820_p10 = pneg %p1025_p2 }
  0x1e   : > { %p819_p9 = scmp.ne.s32.totalorder %s817_s30, %s818_s4  ;;  %s823_s8 = scalar_lea.hbm %s1137_s0, 64 }
  0x1f   : > { %p824_p0 = scmp.lt.s32.totalorder %s817_s30, %s1137_s0  ;;  %p825_p5 = scmp.lt.s32.totalorder %s823_s8, %s818_s4 }
  0x20   : > { %p821_p12 = pnand %p820_p10, %p819_p9 }
  0x21   : > { %p826_p7 = por %p825_p5, %p824_p0 }
  0x22   : > { %p822_p13 = pneg %p821_p12 }
  0x24   : > { %p827_p11 = pnand %p826_p7, %p822_p13 }
  0x26   : > { %830 = shalt.err (!%p827_p11)
}
  0x27   : > { %s922_s11 = smov 256   ;;  %s923_s21 = smov 16  }
  0x28   : > { %705 = dma.hbm_to_vmem [thread:$0]  (!%p1025_p2), %s169_s27, 512, %s171_s26, %s159_s29, %s922_s11, %s922_s11, %s923_s21  }
  0x29   : > { %182 = sbr.rel (%p989_p8) target bundleno = 255 (0xff), region = 32  ;;  %s1042_s22 = sand.u32 (!%p989_p8), 1, %s908_s13  }
  0x2a   : > { %s648_s24 = sshll.u32 (!%p989_p8), %s1042_s22, 5  ;;  %s185_s25 = scalar_lea.sflag (!%p989_p8), [#allocation3], %s1042_s22 }
  0x2b   : > { %s1046_s30 = scalar_lea.vmem (!%p989_p8), [#allocation2], %s648_s24 }
  0x2e   : > { %891 = dma.done.wait (%p976_p4), %s185_s25, 512  }
  0x2f   : > { %893 = vsyncadd (%p976_p4), %s185_s25, 4294966784 }
  0x30   : > { %895 = dma.done.wait (%p41_p1), [#allocation6], 12352  }
  0x31   : > { %897 = vsyncadd (%p41_p1), [#allocation6], 4294954944  ;;  %v286_v0 = vld [vmem:[#allocation5 + $0x1e0] sm:$0xff]  ;;  %v287_v1 = vld [vmem:[#allocation5 + $0x1e8] sm:$0xff]  ;;  %vm332_vm0 = vcmask 523264   ;;  %s651_s18 = sshll.u32 %s1042_s22, 6 }
  0x32   : > { %v319_v2 = vld [vmem:[#allocation5 + $0x2e8] sm:$0xff]  ;;  %339 = vmatpush.msra.mxu0 %v286_v0  ;;  %385 = vmatpush.msra.mxu2 %v287_v1  ;;  %v282_v3 = vld [vmem:[#allocation5 + $0x1c0] sm:$0xff]  ;;  %v320_v31 = vld [vmem:[#allocation5 + $0x2f0] sm:$0xff]  ;;  %s1093_s23 = scalar_lea.vmem [#allocation8], %s651_s18  ;;  %s666_s26 = sshll.u32 %s967_s16, 6 }
  0x33   : > { %v283_v4 = vld [vmem:[#allocation5 + $0x1c8] sm:$0xff]  ;;  %416 = vmatpush.msra.mxu3 %v319_v2  ;;  %v318_v6 = vld [vmem:[#allocation5 + $0x2e0] sm:$0xff]  ;;  %v316_v35 = vld [vmem:[#allocation5 + $0x2d0] sm:$0xff]  ;;  %s543_s29 = scalar_lea.hbm %s1140_s3, %s666_s26  ;;  %s544_s4 = sshll.u32 %s1093_s23, 4  ;;  %s545_s4 = int_to_ptr.vmem [resolvable:$true] %s544_s4 }
  0x34   : > { %v315_v5 = vld [vmem:[#allocation5 + $0x2c8] sm:$0xff]  ;;  %v278_v7 = vld [vmem:[#allocation5 + $0x1a0] sm:$0xff]  ;;  %340 = vmatpush.msra.mxu0 %v282_v3  ;;  %386 = vmatpush.msra.mxu2 %v283_v4  ;;  %v288_v38 = vld [vmem:[#allocation5 + $0x1f0] sm:$0xff]  ;;  %s546_s5 = sshll.u32 %s543_s29, 4  ;;  %s532_s16 = scalar_lea.sflag [#allocation4], %s1042_s22  ;;  %s547_s5 = int_to_ptr.hbm [resolvable:$true] %s546_s5 }
  0x35   : > { %v279_v8 = vld [vmem:[#allocation5 + $0x1a8] sm:$0xff]  ;;  %v314_v10 = vld [vmem:[#allocation5 + $0x2c0] sm:$0xff]  ;;  %417 = vmatpush.msra.mxu3 %v315_v5  ;;  %370 = vmatpush.msra.mxu1 %v318_v6  ;;  %v312_v39 = vld [vmem:[#allocation5 + $0x2b0] sm:$0xff]  ;;  %s860_s7 = sshra.s32 %s547_s5, 4  ;;  %s866_s11 = scalar_lea.hbm %s1140_s3, 128  ;;  %s861_s7 = int_to_ptr.hbm [resolvable:$true] %s860_s7 }
  0x36   : > { %v311_v9 = vld [vmem:[#allocation5 + $0x2a8] sm:$0xff]  ;;  %v274_v11 = vld [vmem:[#allocation5 + $0x180] sm:$0xff]  ;;  %341 = vmatpush.msra.mxu0 %v278_v7  ;;  %387 = vmatpush.msra.mxu2 %v279_v8  ;;  %v284_v42 = vld [vmem:[#allocation5 + $0x1d0] sm:$0xff]  ;;  %s862_s8 = scalar_lea.hbm %s861_s7, 64  ;;  %p867_p11 = scmp.lt.s32.totalorder %s861_s7, %s1140_s3 }
  0x37   : > { %v275_v12 = vld [vmem:[#allocation5 + $0x188] sm:$0xff]  ;;  %v310_v14 = vld [vmem:[#allocation5 + $0x2a0] sm:$0xff]  ;;  %418 = vmatpush.msra.mxu3 %v311_v9  ;;  %371 = vmatpush.msra.mxu1 %v314_v10  ;;  %v308_v43 = vld [vmem:[#allocation5 + $0x290] sm:$0xff]  ;;  %p863_p1 = scmp.ne.s32.totalorder %s861_s7, %s862_s8  ;;  %p868_p2 = scmp.lt.s32.totalorder %s866_s11, %s862_s8 }
  0x38   : > { %v307_v13 = vld [vmem:[#allocation5 + $0x288] sm:$0xff]  ;;  %v270_v15 = vld [vmem:[#allocation5 + $0x160] sm:$0xff]  ;;  %342 = vmatpush.msra.mxu0 %v274_v11  ;;  %388 = vmatpush.msra.mxu2 %v275_v12  ;;  %v280_v46 = vld [vmem:[#allocation5 + $0x1b0] sm:$0xff] }
  0x39   : > { %v271_v16 = vld [vmem:[#allocation5 + $0x168] sm:$0xff]  ;;  %v306_v18 = vld [vmem:[#allocation5 + $0x280] sm:$0xff]  ;;  %419 = vmatpush.msra.mxu3 %v307_v13  ;;  %372 = vmatpush.msra.mxu1 %v310_v14  ;;  %v304_v47 = vld [vmem:[#allocation5 + $0x270] sm:$0xff]  ;;  %p864_p4 = pnand %p863_p1, %p1012_p3  ;;  %p869_p9 = por %p868_p2, %p867_p11 }
  0x3a   : > { %v303_v17 = vld [vmem:[#allocation5 + $0x268] sm:$0xff]  ;;  %v266_v19 = vld [vmem:[#allocation5 + $0x140] sm:$0xff]  ;;  %343 = vmatpush.msra.mxu0 %v270_v15  ;;  %389 = vmatpush.msra.mxu2 %v271_v16  ;;  %v276_v50 = vld [vmem:[#allocation5 + $0x190] sm:$0xff] }
  0x3b   : > { %v267_v20 = vld [vmem:[#allocation5 + $0x148] sm:$0xff]  ;;  %v302_v22 = vld [vmem:[#allocation5 + $0x260] sm:$0xff]  ;;  %420 = vmatpush.msra.mxu3 %v303_v17  ;;  %373 = vmatpush.msra.mxu1 %v306_v18  ;;  %v300_v51 = vld [vmem:[#allocation5 + $0x250] sm:$0xff]  ;;  %p865_p8 = pneg %p864_p4 }
  0x3c   : > { %v299_v21 = vld [vmem:[#allocation5 + $0x248] sm:$0xff]  ;;  %v262_v23 = vld [vmem:[#allocation5 + $0x120] sm:$0xff]  ;;  %344 = vmatpush.msra.mxu0 %v266_v19  ;;  %390 = vmatpush.msra.mxu2 %v267_v20  ;;  %v272_v54 = vld [vmem:[#allocation5 + $0x170] sm:$0xff] }
  0x3d   : > { %v263_v24 = vld [vmem:[#allocation5 + $0x128] sm:$0xff]  ;;  %v298_v26 = vld [vmem:[#allocation5 + $0x240] sm:$0xff]  ;;  %421 = vmatpush.msra.mxu3 %v299_v21  ;;  %374 = vmatpush.msra.mxu1 %v302_v22  ;;  %v296_v55 = vld [vmem:[#allocation5 + $0x230] sm:$0xff]  ;;  %p870_p10 = pnand %p869_p9, %p865_p8 }
  0x3e   : > { %v295_v25 = vld [vmem:[#allocation5 + $0x228] sm:$0xff]  ;;  %v258_v27 = vld [vmem:[#allocation5 + $0x100] sm:$0xff]  ;;  %345 = vmatpush.msra.mxu0 %v262_v23  ;;  %391 = vmatpush.msra.mxu2 %v263_v24  ;;  %v268_v58 = vld [vmem:[#allocation5 + $0x150] sm:$0xff] }
  0x3f   : > { %v259_v28 = vld [vmem:[#allocation5 + $0x108] sm:$0xff]  ;;  %v294_v30 = vld [vmem:[#allocation5 + $0x220] sm:$0xff]  ;;  %422 = vmatpush.msra.mxu3 %v295_v25  ;;  %375 = vmatpush.msra.mxu1 %v298_v26  ;;  %v292_v61 = vld [vmem:[#allocation5 + $0x210] sm:$0xff] }
  0x40   : > { %v291_v29 = vld [vmem:[#allocation5 + $0x208] sm:$0xff]  ;;  %v254_v32 = vld [vmem:[#allocation5 + $0xe0] sm:$0xff]  ;;  %346 = vmatpush.msra.mxu0 %v258_v27  ;;  %392 = vmatpush.msra.mxu2 %v259_v28  ;;  %v264_v63 = vld [vmem:[#allocation5 + $0x130] sm:$0xff] }
  0x41   : > { %v255_v33 = vld [vmem:[#allocation5 + $0xe8] sm:$0xff]  ;;  %v290_v34 = vld [vmem:[#allocation5 + $0x200] sm:$0xff]  ;;  %423 = vmatpush.msra.mxu3 %v291_v29  ;;  %376 = vmatpush.msra.mxu1 %v294_v30  ;;  %v289_v0 = vld [vmem:[#allocation5 + $0x1f8] sm:$0xff] }
  0x42   : > { %v250_v36 = vld [vmem:[#allocation5 + $0xc0] sm:$0xff]  ;;  %347 = vmatpush.msra.mxu0 %v254_v32  ;;  %v251_v37 = vld [vmem:[#allocation5 + $0xc8] sm:$0xff]  ;;  %393 = vmatpush.msra.mxu2 %v255_v33  ;;  %v260_v2 = vld [vmem:[#allocation5 + $0x110] sm:$0xff] }
  0x43   : > { %462 = vmatpush.msrb.mxu3 %v320_v31  ;;  %377 = vmatpush.msra.mxu1 %v290_v34  ;;  %v246_v40 = vld [vmem:[#allocation5 + $0xa0] sm:$0xff]  ;;  %v247_v41 = vld [vmem:[#allocation5 + $0xa8] sm:$0xff]  ;;  %v285_v3 = vld [vmem:[#allocation5 + $0x1d8] sm:$0xff] }
  0x44   : > { %348 = vmatpush.msra.mxu0 %v250_v36  ;;  %394 = vmatpush.msra.mxu2 %v251_v37  ;;  %v242_v44 = vld [vmem:[#allocation5 + $0x80] sm:$0xff]  ;;  %v243_v45 = vld [vmem:[#allocation5 + $0x88] sm:$0xff]  ;;  %v256_v4 = vld [vmem:[#allocation5 + $0xf0] sm:$0xff] }
  0x45   : > { %463 = vmatpush.msrb.mxu3 %v316_v35  ;;  %431 = vmatpush.msrb.mxu1 %v288_v38  ;;  %v238_v48 = vld [vmem:[#allocation5 + $0x60] sm:$0xff]  ;;  %v239_v49 = vld [vmem:[#allocation5 + $0x68] sm:$0xff]  ;;  %v281_v5 = vld [vmem:[#allocation5 + $0x1b8] sm:$0xff] }
  0x46   : > { %349 = vmatpush.msra.mxu0 %v246_v40  ;;  %395 = vmatpush.msra.mxu2 %v247_v41  ;;  %v234_v52 = vld [vmem:[#allocation5 + $0x40] sm:$0xff]  ;;  %v235_v53 = vld [vmem:[#allocation5 + $0x48] sm:$0xff]  ;;  %v321_v6 = vld [vmem:[#allocation5 + $0x2f8] sm:$0xff] }
  0x47   : > { %464 = vmatpush.msrb.mxu3 %v312_v39  ;;  %432 = vmatpush.msrb.mxu1 %v284_v42  ;;  %v230_v56 = vld [vmem:[#allocation5 + $0x20] sm:$0xff]  ;;  %v231_v57 = vld [vmem:[#allocation5 + $0x28] sm:$0xff]  ;;  %v252_v7 = vld [vmem:[#allocation5 + $0xd0] sm:$0xff] }
  0x48   : > { %350 = vmatpush.msra.mxu0 %v242_v44  ;;  %396 = vmatpush.msra.mxu2 %v243_v45  ;;  %v1057_v59 = vld [vmem:[%s1046_s30 + $0x8] sm:$0xff]  ;;  %v226_v60 = vld [vmem:[#allocation5] sm:$0xff]  ;;  %v277_v8 = vld [vmem:[#allocation5 + $0x198] sm:$0xff] }
  0x49   : > { %465 = vmatpush.msrb.mxu3 %v308_v43  ;;  %433 = vmatpush.msrb.mxu1 %v280_v46  ;;  %v227_v62 = vld [vmem:[#allocation5 + $0x8] sm:$0xff]  ;;  %v1062_v1 = vld [vmem:[%s1046_s30] sm:$0xff]  ;;  %v1068_v9 = vld [vmem:[%s1046_s30 + $0x18] sm:$0xff] }
  0x4a   : > { %351 = vmatpush.msra.mxu0 %v238_v48  ;;  %397 = vmatpush.msra.mxu2 %v239_v49  ;;  %v248_v10 = vld [vmem:[#allocation5 + $0xb0] sm:$0xff]  ;;  %v273_v11 = vld [vmem:[#allocation5 + $0x178] sm:$0xff]  ;;  %v322_v36 = vld [vmem:[#allocation7] sm:$0xf] }
  0x4b   : > { %466 = vmatpush.msrb.mxu3 %v304_v47  ;;  %434 = vmatpush.msrb.mxu1 %v276_v50  ;;  %v1071_v12 = vld [vmem:[%s1046_s30 + $0x10] sm:$0xff]  ;;  %v269_v14 = vld [vmem:[#allocation5 + $0x158] sm:$0xff]  ;;  %v325_v39 = vperm.slane %v322_v36, 1  ;;  %v324_v42 = vperm.slane %v322_v36, 0 }
  0x4c   : > { %352 = vmatpush.msra.mxu0 %v234_v52  ;;  %398 = vmatpush.msra.mxu2 %v235_v53  ;;  %v244_v13 = vld [vmem:[#allocation5 + $0x90] sm:$0xff]  ;;  %v317_v15 = vld [vmem:[#allocation5 + $0x2d8] sm:$0xff]  ;;  %v326_v52 = vperm.slane %v322_v36, 2 }
  0x4d   : > { %467 = vmatpush.msrb.mxu3 %v300_v51  ;;  %435 = vmatpush.msrb.mxu1 %v272_v54  ;;  %v240_v16 = vld [vmem:[#allocation5 + $0x70] sm:$0xff]  ;;  %v265_v17 = vld [vmem:[#allocation5 + $0x138] sm:$0xff] }
  0x4e   : > { %353 = vmatpush.msra.mxu0 %v230_v56  ;;  %399 = vmatpush.msra.mxu2 %v231_v57  ;;  %v313_v18 = vld [vmem:[#allocation5 + $0x2b8] sm:$0xff]  ;;  %v236_v19 = vld [vmem:[#allocation5 + $0x50] sm:$0xff] }
  0x4f   : > { %468 = vmatpush.msrb.mxu3 %v296_v55  ;;  %436 = vmatpush.msrb.mxu1 %v268_v58  ;;  %v261_v20 = vld [vmem:[#allocation5 + $0x118] sm:$0xff]  ;;  %v232_v22 = vld [vmem:[#allocation5 + $0x30] sm:$0xff] }
  0x50   : > { %654 = vmatmul.msk.f32.vlgmr.msra.gmra.mxu3 %vm332_vm0, %v1057_v59  ;;  %354 = vmatpush.msra.mxu0 %v226_v60  ;;  %v309_v21 = vld [vmem:[#allocation5 + $0x298] sm:$0xff]  ;;  %v228_v25 = vld [vmem:[#allocation5 + $0x10] sm:$0xff] }
  0x51   : > { %469 = vmatpush.msrb.mxu3 %v292_v61  ;;  %400 = vmatpush.msra.mxu2 %v227_v62  ;;  %v257_v23 = vld [vmem:[#allocation5 + $0xf8] sm:$0xff] }
  0x52   : > { %437 = vmatpush.msrb.mxu1 %v264_v63  ;;  %401 = vmatmul.f32.vlgmr.msra.gmra.mxu2 %v1062_v1  ;;  %v305_v24 = vld [vmem:[#allocation5 + $0x278] sm:$0xff]  ;;  %v327_v63 = vperm.slane %v322_v36, 3 }
  0x53   : > { %667 = vmatpush.msra.mxu3 %v289_v0  ;;  %477 = vmatpush.msrb.mxu0 %v289_v0  ;;  %v253_v26 = vld [vmem:[#allocation5 + $0xd8] sm:$0xff] }
  0x54   : > { %438 = vmatpush.msrb.mxu1 %v260_v2  ;;  %508 = vmatpush.msrb.mxu2 %v321_v6  ;;  %v301_v27 = vld [vmem:[#allocation5 + $0x258] sm:$0xff] }
  0x55   : > { %668 = vmatpush.msra.mxu3 %v285_v3  ;;  %652 = vmatmul.msk.f32.vlgmr.msra.gmra.mxu1 %vm332_vm0, %v1057_v59  ;;  %v249_v28 = vld [vmem:[#allocation5 + $0xb8] sm:$0xff] }
  0x56   : > { %478 = vmatpush.msrb.mxu0 %v285_v3  ;;  %439 = vmatpush.msrb.mxu1 %v256_v4  ;;  %v297_v29 = vld [vmem:[#allocation5 + $0x238] sm:$0xff] }
  0x57   : > { %669 = vmatpush.msra.mxu3 %v281_v5  ;;  %355 = vmatmul.f32.vlgmr.msra.gmra.mxu0 %v1062_v1  ;;  %v245_v30 = vld [vmem:[#allocation5 + $0x98] sm:$0xff] }
  0x58   : > { %479 = vmatpush.msrb.mxu0 %v281_v5  ;;  %440 = vmatpush.msrb.mxu1 %v252_v7  ;;  %v293_v31 = vld [vmem:[#allocation5 + $0x218] sm:$0xff] }
  0x59   : > { %670 = vmatpush.msra.mxu3 %v277_v8  ;;  %509 = vmatpush.msrb.mxu2 %v317_v15  ;;  %v241_v32 = vld [vmem:[#allocation5 + $0x78] sm:$0xff] }
  0x5a   : > { %655 = vmatmul.msk.f32.gmra.mxu3 %vm332_vm0, %v1068_v9  ;;  %480 = vmatpush.msrb.mxu0 %v277_v8  ;;  %v237_v33 = vld [vmem:[#allocation5 + $0x58] sm:$0xff] }
  0x5b   : > { %441 = vmatpush.msrb.mxu1 %v248_v10  ;;  %671 = vmatpush.msra.mxu3 %v273_v11  ;;  %v233_v34 = vld [vmem:[#allocation5 + $0x38] sm:$0xff] }
  0x5c   : > { %404 = vmatmul.f32.gmra.mxu2 %v1071_v12  ;;  %481 = vmatpush.msrb.mxu0 %v273_v11  ;;  %v229_v35 = vld [vmem:[#allocation5 + $0x18] sm:$0xff] }
  0x5d   : > { %442 = vmatpush.msrb.mxu1 %v244_v13  ;;  %672 = vmatpush.msra.mxu3 %v269_v14 }
  0x5e   : > { %653 = vmatmul.msk.f32.gmra.mxu1 %vm332_vm0, %v1068_v9  ;;  %482 = vmatpush.msrb.mxu0 %v269_v14 }
  0x5f   : > { %443 = vmatpush.msrb.mxu1 %v240_v16  ;;  %673 = vmatpush.msra.mxu3 %v265_v17 }
  0x60   : > { %483 = vmatpush.msrb.mxu0 %v265_v17  ;;  %510 = vmatpush.msrb.mxu2 %v313_v18 }
  0x61   : > { %444 = vmatpush.msrb.mxu1 %v236_v19  ;;  %674 = vmatpush.msra.mxu3 %v261_v20 }
  0x62   : > { %656 = vmatmul.msk.f32.vlgmr.msrb.gmra.mxu3 %vm332_vm0, %v1057_v59  ;;  %484 = vmatpush.msrb.mxu0 %v261_v20 }
  0x63   : > { %511 = vmatpush.msrb.mxu2 %v309_v21  ;;  %445 = vmatpush.msrb.mxu1 %v232_v22 }
  0x64   : > { %675 = vmatpush.msra.mxu3 %v257_v23  ;;  %485 = vmatpush.msrb.mxu0 %v257_v23 }
  0x65   : > { %512 = vmatpush.msrb.mxu2 %v305_v24  ;;  %446 = vmatpush.msrb.mxu1 %v228_v25 }
  0x66   : > { %676 = vmatpush.msra.mxu3 %v253_v26  ;;  %358 = vmatmul.f32.gmra.mxu0 %v1071_v12 }
  0x67   : > { %447 = vmatmul.f32.vlgmr.msrb.gmra.mxu1 %v1062_v1  ;;  %486 = vmatpush.msrb.mxu0 %v253_v26 }
  0x68   : > { %513 = vmatpush.msrb.mxu2 %v301_v27  ;;  %677 = vmatpush.msra.mxu3 %v249_v28 }
  0x69   : > { %487 = vmatpush.msrb.mxu0 %v249_v28 }
  0x6a   : > { %514 = vmatpush.msrb.mxu2 %v297_v29  ;;  %678 = vmatpush.msra.mxu3 %v245_v30 }
  0x6b   : > { %657 = vmatmul.msk.f32.gmra.mxu3 %vm332_vm0, %v1068_v9  ;;  %488 = vmatpush.msrb.mxu0 %v245_v30 }
  0x6c   : > { %515 = vmatpush.msrb.mxu2 %v293_v31  ;;  %679 = vmatpush.msra.mxu3 %v241_v32 }
  0x6d   : > { %489 = vmatpush.msrb.mxu0 %v241_v32  ;;  %658 = vmatmul.msk.f32.vlgmr.msrb.gmra.mxu2 %vm332_vm0, %v1057_v59 }
  0x6e   : > { %680 = vmatpush.msra.mxu3 %v237_v33 }
  0x6f   : > { %450 = vmatmul.f32.gmra.mxu1 %v1071_v12  ;;  %490 = vmatpush.msrb.mxu0 %v237_v33 }
  0x70   : > { %681 = vmatpush.msra.mxu3 %v233_v34 }
  0x71   : > { %491 = vmatpush.msrb.mxu0 %v233_v34 }
  0x72   : > { %682 = vmatpush.msra.mxu3 %v229_v35 }
  0x73   : > { %492 = vmatpush.msrb.mxu0 %v229_v35  ;;  %496 = vmatmul.f32.vlgmr.msra.gmra.mxu3 %v1071_v12 }
  0x74   : > { %493 = vmatmul.f32.vlgmr.msrb.gmra.mxu0 %v1062_v1 }
  0x75   : > { %659 = vmatmul.msk.f32.gmra.mxu2 %vm332_vm0, %v1068_v9 }
  0xd2   : > { %v379_v37 = vpop.f32.mrf.mxu1 }
  0xd3   : > { %v425_v38 = vpop.f32.mrf.mxu3 }
  0xd4   : > { %v356_v44 = vpop.f32.mrf.mxu0 }
  0xd5   : > { %v402_v40 = vpop.f32.mrf.mxu2  ;;  %v357_v46 = vadd.f32 %v356_v44, %v324_v42 }
  0xd6   : > { %v403_v41 = vadd.f32 %v402_v40, %v325_v39 }
  0xd7   : > { %v380_v48 = vadd.f32 %v379_v37, %v357_v46 }
  0xd8   : > { %v426_v43 = vadd.f32 %v425_v38, %v403_v41 }
  0xd9   : > { %523 = vst [vmem:[%s1093_s23] sm:$0xff] %v380_v48 }
  0xda   : > { %524 = vst [vmem:[%s1093_s23 + $0x8] sm:$0xff] %v426_v43 }
  0xdb   : > { %v382_v45 = vpop.f32.mrf.mxu1 }
  0xdd   : > { %v428_v47 = vpop.f32.mrf.mxu3 }
  0xdf   : > { %v405_v49 = vpop.f32.mrf.mxu2 }
  0xe0   : > { %v406_v50 = vadd.f32 %v405_v49, %v325_v39 }
  0xe2   : > { %v429_v51 = vadd.f32 %v428_v47, %v406_v50 }
  0xe3   : > { %v359_v53 = vpop.f32.mrf.mxu0 }
  0xe4   : > { %528 = vst [vmem:[%s1093_s23 + $0x28] sm:$0xff] %v429_v51  ;;  %v360_v54 = vadd.f32 %v359_v53, %v324_v42  ;;  %v448_v55 = vpop.f32.mrf.mxu1 }
  0xe5   : > { %v449_v56 = vadd.f32 %v448_v55, %v326_v52  ;;  %v471_v57 = vpop.f32.mrf.mxu3 }
  0xe6   : > { %v383_v58 = vadd.f32 %v382_v45, %v360_v54 }
  0xe7   : > { %v472_v59 = vadd.f32 %v471_v57, %v449_v56 }
  0xe8   : > { %527 = vst [vmem:[%s1093_s23 + $0x20] sm:$0xff] %v383_v58 }
  0xe9   : > { %525 = vst [vmem:[%s1093_s23 + $0x10] sm:$0xff] %v472_v59 }
  0xec   : > { %v451_v60 = vpop.f32.mrf.mxu1 }
  0xed   : > { %v452_v61 = vadd.f32 %v451_v60, %v326_v52 }
  0xee   : > { %v474_v62 = vpop.f32.mrf.mxu3 }
  0xef   : > { %v475_v0 = vadd.f32 %v474_v62, %v452_v61 }
  0xf0   : > { %v517_v1 = vpop.f32.mrf.mxu2 }
  0xf1   : > { %529 = vst [vmem:[%s1093_s23 + $0x30] sm:$0xff] %v475_v0  ;;  %v494_v2 = vpop.f32.mrf.mxu0 }
  0xf2   : > { %v495_v3 = vadd.f32 %v494_v2, %v327_v63 }
  0xf4   : > { %v518_v4 = vadd.f32 %v517_v1, %v495_v3 }
  0xf6   : > { %526 = vst [vmem:[%s1093_s23 + $0x18] sm:$0xff] %v518_v4  ;;  %v497_v5 = vpop.f32.mrf.mxu3 }
  0xf7   : > { %v498_v6 = vadd.f32 %v497_v5, %v327_v63 }
  0xf8   : > { %v520_v7 = vpop.f32.mrf.mxu2 }
  0xf9   : > { %v521_v8 = vadd.f32 %v520_v7, %v498_v6 }
  0xfb   : > { %530 = vst [vmem:[%s1093_s23 + $0x38] sm:$0xff] %v521_v8 }
  0xfc   : > { %873 = shalt.err (!%p870_p10)
}
  0xfd   : > { %s924_s22 = smov 512   ;;  %s925_s25 = smov 32  }
  0xfe   : > { %693 = dma.vmem_to_hbm [thread:$0]  (%p1012_p3), %s545_s4, 1024, %s547_s5, %s532_s16, %s924_s22, %s924_s22, %s925_s25  }
  0xff PF: > { %s561_s30 = sand.u32 1, %s904_s12   ;;  %p1146_p12 = scmp.ge.s32.totalorder %s916_s15, 2 }
 0x100   : > { %s562_s18 = scalar_lea.sflag [#allocation4], %s561_s30 }
 0x101   : > { %p707_p13 = pnand %p1146_p12, %p981_p6 }
 0x103   : > { %p708_p0 = pneg %p707_p13 }
 0x105   : > { %899 = dma.done.wait (%p708_p0), %s562_s18, 1024  }
 0x106   : > { %901 = vsyncadd (%p708_p0), %s562_s18, 4294966272  ;;  %p17_p5 = scmp.ge.s32.totalorder %s1002_s6, 4   ;;  %s1147_s12 = smov %s908_s13 }
 0x107   : > { %s1148_s13 = smov %s912_s14  ;;  %s1149_s14 = smov %s1018_s10 }
 0x108   : > { %s1150_s15 = smov %s1002_s6  ;;  %19 = sbr.rel (!%p17_p5) target bundleno = 6 (0x6), region = 85 }
 0x10d   :  { %568 = vsyncpa [#allocation3], 1 }
 0x10e   :  { %570 = vsyncpa [#allocation3 + $0x1], 1 }
 0x10f   :  { %571 = vsyncpa [#allocation6], 1 }
 0x110   :  { %572 = vsyncpa [#allocation4], 1 }
 0x111   :  { %574 = vsyncpa [#allocation4 + $0x1], 1 }

</bundles_post_ra>
